<compile_context>
chip_gen: v6e
topology: v6e:2x2x1
jax: 0.10.0
libtpu: 0.0.40
codegen_flags: <defaults>
</compile_context>

<pallas_src>
import functools
import numpy as np
import jax
import jax.numpy as jnp
from jax import lax
from jax.experimental import pallas as pl
from jax.experimental.pallas import tpu as pltpu

INPUT_DIM = 50     # ODEGRU input_dim
HIDDEN = 30        # ODEGRU hidden_size
DRIFT_HIDDEN = 64  # ODEGRUDrift inner width
CONTEXT = 3        # context_net out
LATENT = 20        # qz0_net out (chunked 10/10)
ODE_STEP = 0.05    # odeint(..., method='rk4', options={'step_size': 0.05})


def _encoder_kernel(seq,
                    dts_ref, cnt_ref, x_ref,
                    wx_ref, bx_ref, wh_ref, bnh_ref,
                    w1_ref, b1_ref, w2_ref, b2_ref,
                    wc_ref, bc_ref, wq_ref, bq_ref,
                    ctx_out, qz0_out,
                    gx_slab, h_slab):
    rows = x_ref.shape[0]          # seq * Bp
    Bp = rows // seq               # padded batch (multiple of 8)
    H = wh_ref.shape[0]            # hidden size (30)

    # Hoist loop-invariant weight loads out of the recurrence.
    Wh = wh_ref[...]
    Bnh = bnh_ref[...]
    W1 = w1_ref[...]; B1 = b1_ref[...]
    W2 = w2_ref[...]; B2 = b2_ref[...]

    # Input-side GRU gate pre-activations for ALL timesteps in one batched
    # matmul (x does not depend on h -> off the recurrent critical path);
    # the packed bias [bir+bhr | biz+bhz | bin] is folded in here once.
    gx_slab[...] = (jnp.dot(x_ref[...], wx_ref[...],
                            preferred_element_type=jnp.float32) + bx_ref[...])

    def sigmoid(v):
        # EUP-approx reciprocal: the divide leaves the VALU slot free.
        return pl.reciprocal(1.0 + jnp.exp(-v), approx=True)

    def drift(y):
        # ODEGRUDrift: Linear(30,64) -> tanh -> Linear(64,30); autonomous.
        h1 = jnp.tanh(jnp.dot(y, W1, preferred_element_type=jnp.float32) + B1)
        return jnp.dot(h1, W2, preferred_element_type=jnp.float32) + B2

    def step(i, h):
        # i = reversed-sequence index; original position = seq - 1 - i.
        idx = seq - 1 - i
        row0 = pl.multiple_of(idx * Bp, 8)

        # ---- nn.GRUCell (PyTorch gate semantics); only the h-side matmul is
        # serial, gates fused 3 -> 1 matmul, input side precomputed above ----
        gx = gx_slab[pl.ds(row0, Bp), :]                          # (Bp, 3H)
        gh = jnp.dot(h, Wh, preferred_element_type=jnp.float32)   # (Bp, 3H)
        r = sigmoid(gx[:, 0:H] + gh[:, 0:H])
        z = sigmoid(gx[:, H:2 * H] + gh[:, H:2 * H])
        n = jnp.tanh(gx[:, 2 * H:3 * H] + r * (gh[:, 2 * H:3 * H] + Bnh))
        h = (1.0 - z) * n + z * h

        # ---- ODE evolution to the next (reversed) time point ----
        # torchdiffeq fixed-grid 'rk4' (3/8 rule); signed sub-step dts were
        # precomputed on the host.  Only the real sub-steps run (dynamic count;
        # the last reversed step runs 0, matching `if i < seq-1`).
        def substep(j, hh):
            dt = dts_ref[i, j]
            k1 = drift(hh)
            k2 = drift(hh + dt * k1 * (1.0 / 3.0))
            k3 = drift(hh + dt * (k2 - k1 * (1.0 / 3.0)))
            k4 = drift(hh + dt * (k1 - k2 + k3))
            return hh + dt * 0.125 * (k1 + 3.0 * (k2 + k3) + k4)

        h = lax.fori_loop(0, cnt_ref[i], substep, h)

        # Store into the hidden slab in *original* time order (flattened rows).
        h_slab[pl.ds(row0, Bp), :] = h
        return h

    h_last = lax.fori_loop(0, seq, step, jnp.zeros((Bp, H), jnp.float32))

    # ---- heads, once, off the recurrent critical path ----
    ctx_out[...] = (jnp.dot(h_slab[...], wc_ref[...],
                            preferred_element_type=jnp.float32) + bc_ref[...])
    # hidden[0] is the h after the last reversed step == final loop carry.
    qz0_out[...] = (jnp.dot(h_last, wq_ref[...],
                            preferred_element_type=jnp.float32) + bq_ref[...])


def build_ode_dts(t_np, step_size=ODE_STEP):
    """Replicates torchdiffeq's fixed-grid construction (reverse-time handling
    folded into signed dts) for each interval of the reversed t.
    Returns (dts table, per-row real sub-step counts)."""
    t_np = np.asarray(t_np, dtype=np.float32)
    seq = t_np.shape[0]
    rev_t = t_np[::-1]
    rows = []
    for i in range(seq - 1):
        t0, t1 = np.float32(rev_t[i]), np.float32(rev_t[i + 1])
        delta = np.float32(t1 - t0)
        if delta == 0.0:
            rows.append(np.zeros((0,), np.float32))
            continue
        niters = int(np.ceil(abs(delta) / np.float32(step_size) + 1.0))
        sign = np.float32(1.0 if delta > 0 else -1.0)
        grid = (np.float32(t0)
                + sign * np.float32(step_size) * np.arange(niters, dtype=np.float32))
        grid[-1] = t1
        rows.append(np.diff(grid).astype(np.float32))
    rows.append(np.zeros((0,), np.float32))  # last reversed step: no ODE solve
    n_sub = max(1, max(r.shape[0] for r in rows))
    dts = np.zeros((seq, n_sub), np.float32)
    counts = np.zeros((seq,), np.int32)
    for i, r in enumerate(rows):
        dts[i, :r.shape[0]] = r
        counts[i] = r.shape[0]
    return dts, counts


def init_params(key):
    ks = jax.random.split(key, 20)
    H, D, DH, C, L = HIDDEN, INPUT_DIM, DRIFT_HIDDEN, CONTEXT, LATENT

    def u(k, shape, fan_in):
        bound = 1.0 / np.sqrt(fan_in)
        return jax.random.uniform(k, shape, jnp.float32, -bound, bound)

    p = {}
    # GRUCell weights stored transposed (in_features, out_features); biases (1, H)
    p["wxr"] = u(ks[0], (D, H), H); p["wxz"] = u(ks[1], (D, H), H); p["wxn"] = u(ks[2], (D, H), H)
    p["whr"] = u(ks[3], (H, H), H); p["whz"] = u(ks[4], (H, H), H); p["whn"] = u(ks[5], (H, H), H)
    p["bir"] = u(ks[6], (1, H), H); p["biz"] = u(ks[7], (1, H), H); p["bin"] = u(ks[8], (1, H), H)
    p["bhr"] = u(ks[9], (1, H), H); p["bhz"] = u(ks[10], (1, H), H); p["bhn"] = u(ks[11], (1, H), H)
    # ODEGRUDrift: Linear(30,64) then Linear(64,30)
    p["w1"] = u(ks[12], (H, DH), H); p["b1"] = u(ks[13], (1, DH), H)
    p["w2"] = u(ks[14], (DH, H), DH); p["b2"] = u(ks[15], (1, H), DH)
    # context_net Linear(30,3), qz0_net Linear(30,20)
    p["wc"] = u(ks[16], (H, C), H); p["bc"] = u(ks[17], (1, C), H)
    p["wq"] = u(ks[18], (H, L), H); p["bq"] = u(ks[19], (1, L), H)
    return p


def encoder_forward(x, dts, counts, params):
    seq, B, D = x.shape
    H, C, L = HIDDEN, CONTEXT, LATENT

    # Pad batch to the 8-sublane granularity; padded rows are discarded below.
    Bp = ((B + 7) // 8) * 8
    if Bp != B:
        x = jnp.concatenate([x, jnp.zeros((seq, Bp - B, D), x.dtype)], axis=1)
    x2d = x.reshape(seq * Bp, D)

    # Host-side GRU gate packing (3 matmuls -> 1 per step) + bias folding.
    wx = jnp.concatenate([params["wxr"], params["wxz"], params["wxn"]], axis=1)  # (D, 3H)
    bx = jnp.concatenate([params["bir"] + params["bhr"],
                          params["biz"] + params["bhz"],
                          params["bin"]], axis=1)                                 # (1, 3H)
    wh = jnp.concatenate([params["whr"], params["whz"], params["whn"]], axis=1)  # (H, 3H)
    weights = [wx, bx, wh, params["bhn"],
               params["w1"], params["b1"], params["w2"], params["b2"],
               params["wc"], params["bc"], params["wq"], params["bq"]]

    smem = pl.BlockSpec(memory_space=pltpu.MemorySpace.SMEM)
    vmem = pl.BlockSpec(memory_space=pltpu.MemorySpace.VMEM)

    ctx2d, qz0 = pl.pallas_call(
        functools.partial(_encoder_kernel, seq),
        out_shape=(jax.ShapeDtypeStruct((seq * Bp, C), jnp.float32),
                   jax.ShapeDtypeStruct((Bp, L), jnp.float32)),
        in_specs=[smem, smem, vmem] + [vmem] * len(weights),
        out_specs=(vmem, vmem),
        scratch_shapes=[pltpu.VMEM((seq * Bp, 3 * H), jnp.float32),   # gx slab
                        pltpu.VMEM((seq * Bp, H), jnp.float32)],      # hidden slab
    )(dts, counts, x2d, *weights)

    context = ctx2d.reshape(seq, Bp, C)[:, :B, :]
    qz0 = qz0[:B]
    qz0_mean = qz0[:, :L // 2]
    qz0_logstd = qz0[:, L // 2:]
    return qz0_mean, qz0_logstd, context


if __name__ == "__main__":
    key = jax.random.PRNGKey(0)
    k_param, k_x = jax.random.split(key)
    params = init_params(k_param)

    seq_len, batch = 8, 4
    x = jax.random.normal(k_x, (seq_len, batch, INPUT_DIM), jnp.float32)
    t = jnp.arange(seq_len, dtype=jnp.float32) * 0.1

    dts_np, counts_np = build_ode_dts(np.asarray(t))   # signed RK4 sub-step dts + counts
    dts = jnp.asarray(dts_np)
    counts = jnp.asarray(counts_np)

    qz0_mean, qz0_logstd, context = encoder_forward(x, dts, counts, params)
    jax.block_until_ready((qz0_mean, qz0_logstd, context))

    assert qz0_mean.shape == (batch, LATENT // 2)
    assert qz0_logstd.shape == (batch, LATENT // 2)
    assert context.shape == (seq_len, batch, CONTEXT)
    assert bool(jnp.all(jnp.isfinite(qz0_mean))
                & jnp.all(jnp.isfinite(qz0_logstd))
                & jnp.all(jnp.isfinite(context)))
    print("KERNEL_OK")
</pallas_src>

<mosaic_0001>
module attributes {stable_mosaic.version = 11 : i64} {
  func.func @_encoder_kernel(%arg0: memref<8x3xf32, #tpu.memory_space<smem>>, %arg1: memref<8xi32, #tpu.memory_space<smem>>, %arg2: memref<64x50xf32, #tpu.memory_space<vmem>>, %arg3: memref<50x90xf32, #tpu.memory_space<vmem>>, %arg4: memref<1x90xf32, #tpu.memory_space<vmem>>, %arg5: memref<30x90xf32, #tpu.memory_space<vmem>>, %arg6: memref<1x30xf32, #tpu.memory_space<vmem>>, %arg7: memref<30x64xf32, #tpu.memory_space<vmem>>, %arg8: memref<1x64xf32, #tpu.memory_space<vmem>>, %arg9: memref<64x30xf32, #tpu.memory_space<vmem>>, %arg10: memref<1x30xf32, #tpu.memory_space<vmem>>, %arg11: memref<30x3xf32, #tpu.memory_space<vmem>>, %arg12: memref<1x3xf32, #tpu.memory_space<vmem>>, %arg13: memref<30x20xf32, #tpu.memory_space<vmem>>, %arg14: memref<1x20xf32, #tpu.memory_space<vmem>>, %arg15: memref<64x3xf32, #tpu.memory_space<vmem>>, %arg16: memref<8x20xf32, #tpu.memory_space<vmem>>, %arg17: memref<64x90xf32, #tpu.memory_space<vmem>>, %arg18: memref<64x30xf32, #tpu.memory_space<vmem>>) attributes {dimension_semantics = [], scalar_prefetch = 0 : i64, scratch_operands = 2 : i64, tpu.core_type = #tpu.core_type<tc>} {
    %c0 = arith.constant 0 : index
    %c0_0 = arith.constant 0 : index
    %0 = vector.load %arg5[%c0, %c0_0] : memref<30x90xf32, #tpu.memory_space<vmem>>, vector<30x90xf32>
    %c0_1 = arith.constant 0 : index
    %c0_2 = arith.constant 0 : index
    %1 = vector.load %arg6[%c0_1, %c0_2] : memref<1x30xf32, #tpu.memory_space<vmem>>, vector<1x30xf32>
    %c0_3 = arith.constant 0 : index
    %c0_4 = arith.constant 0 : index
    %2 = vector.load %arg7[%c0_3, %c0_4] : memref<30x64xf32, #tpu.memory_space<vmem>>, vector<30x64xf32>
    %c0_5 = arith.constant 0 : index
    %c0_6 = arith.constant 0 : index
    %3 = vector.load %arg8[%c0_5, %c0_6] : memref<1x64xf32, #tpu.memory_space<vmem>>, vector<1x64xf32>
    %c0_7 = arith.constant 0 : index
    %c0_8 = arith.constant 0 : index
    %4 = vector.load %arg9[%c0_7, %c0_8] : memref<64x30xf32, #tpu.memory_space<vmem>>, vector<64x30xf32>
    %c0_9 = arith.constant 0 : index
    %c0_10 = arith.constant 0 : index
    %5 = vector.load %arg10[%c0_9, %c0_10] : memref<1x30xf32, #tpu.memory_space<vmem>>, vector<1x30xf32>
    %c0_11 = arith.constant 0 : index
    %c0_12 = arith.constant 0 : index
    %6 = vector.load %arg2[%c0_11, %c0_12] : memref<64x50xf32, #tpu.memory_space<vmem>>, vector<64x50xf32>
    %c0_13 = arith.constant 0 : index
    %c0_14 = arith.constant 0 : index
    %7 = vector.load %arg3[%c0_13, %c0_14] : memref<50x90xf32, #tpu.memory_space<vmem>>, vector<50x90xf32>
    %cst = arith.constant dense<0.000000e+00> : vector<64x90xf32>
    %8 = tpu.matmul %6, %7, %cst {dimension_numbers = #tpu.dot_dimension_numbers<[1], [0], [0], [1], [0, 0, 1, 1], [], []>} : vector<64x50xf32>, vector<50x90xf32>, vector<64x90xf32> -> vector<64x90xf32>
    %c0_15 = arith.constant 0 : index
    %c0_16 = arith.constant 0 : index
    %9 = vector.load %arg4[%c0_15, %c0_16] : memref<1x90xf32, #tpu.memory_space<vmem>>, vector<1x90xf32>
    %10 = vector.broadcast %9 : vector<1x90xf32> to vector<64x90xf32>
    %11 = arith.addf %8, %10 : vector<64x90xf32>
    %c0_17 = arith.constant 0 : index
    %c0_18 = arith.constant 0 : index
    %12 = vector.load %arg17[%c0_17, %c0_18] : memref<64x90xf32, #tpu.memory_space<vmem>>, vector<64x90xf32>
    tpu.vector_store %arg17[%c0_17, %c0_18], %11 {strides = array<i32>} : memref<64x90xf32, #tpu.memory_space<vmem>>, vector<64x90xf32>,
    %cst_19 = arith.constant 0.000000e+00 : f32
    %13 = vector.broadcast %cst_19 : f32 to vector<8x30xf32>
    %c0_i32 = arith.constant 0 : i32
    %c8_i32 = arith.constant 8 : i32
    %14 = arith.addi %c0_i32, %c8_i32 : i32
    %c1_i32 = arith.constant 1 : i32
    %15 = scf.for %arg19 = %c0_i32 to %14 step %c1_i32 iter_args(%arg20 = %13) -> (vector<8x30xf32>)  : i32 {
      %c7_i32 = arith.constant 7 : i32
      %29 = arith.subi %c7_i32, %arg19 : i32
      %c8_i32_37 = arith.constant 8 : i32
      %30 = arith.muli %29, %c8_i32_37 : i32
      %31 = tpu.assume_multiple %30, 8 : i32
      %32 = arith.index_cast %31 : i32 to index
      %c0_38 = arith.constant 0 : index
      %33 = vector.load %arg17[%32, %c0_38] : memref<64x90xf32, #tpu.memory_space<vmem>>, vector<8x90xf32>
      %cst_39 = arith.constant dense<0.000000e+00> : vector<8x90xf32>
      %34 = tpu.matmul %arg20, %0, %cst_39 {dimension_numbers = #tpu.dot_dimension_numbers<[1], [0], [0], [1], [0, 0, 1, 1], [], []>} : vector<8x30xf32>, vector<30x90xf32>, vector<8x90xf32> -> vector<8x90xf32>
      %35 = vector.extract_strided_slice %33 {offsets = [0, 0], sizes = [8, 30], strides = [1, 1]} : vector<8x90xf32> to vector<8x30xf32>
      %36 = vector.extract_strided_slice %34 {offsets = [0, 0], sizes = [8, 30], strides = [1, 1]} : vector<8x90xf32> to vector<8x30xf32>
      %37 = arith.addf %35, %36 : vector<8x30xf32>
      %cst_40 = arith.constant 0.000000e+00 : f32
      %38 = vector.broadcast %cst_40 : f32 to vector<8x30xf32>
      %39 = arith.subf %38, %37 : vector<8x30xf32>
      %40 = math.exp %39 : vector<8x30xf32>
      %cst_41 = arith.constant 1.000000e+00 : f32
      %41 = vector.broadcast %cst_41 : f32 to vector<8x30xf32>
      %42 = arith.addf %41, %40 : vector<8x30xf32>
      %43 = tpu.reciprocal %42 {approx = true} : vector<8x30xf32> -> vector<8x30xf32>
      %44 = vector.extract_strided_slice %33 {offsets = [0, 30], sizes = [8, 30], strides = [1, 1]} : vector<8x90xf32> to vector<8x30xf32>
      %45 = vector.extract_strided_slice %34 {offsets = [0, 30], sizes = [8, 30], strides = [1, 1]} : vector<8x90xf32> to vector<8x30xf32>
      %46 = arith.addf %44, %45 : vector<8x30xf32>
      %cst_42 = arith.constant 0.000000e+00 : f32
      %47 = vector.broadcast %cst_42 : f32 to vector<8x30xf32>
      %48 = arith.subf %47, %46 : vector<8x30xf32>
      %49 = math.exp %48 : vector<8x30xf32>
      %cst_43 = arith.constant 1.000000e+00 : f32
      %50 = vector.broadcast %cst_43 : f32 to vector<8x30xf32>
      %51 = arith.addf %50, %49 : vector<8x30xf32>
      %52 = tpu.reciprocal %51 {approx = true} : vector<8x30xf32> -> vector<8x30xf32>
      %53 = vector.extract_strided_slice %33 {offsets = [0, 60], sizes = [8, 30], strides = [1, 1]} : vector<8x90xf32> to vector<8x30xf32>
      %54 = vector.extract_strided_slice %34 {offsets = [0, 60], sizes = [8, 30], strides = [1, 1]} : vector<8x90xf32> to vector<8x30xf32>
      %55 = vector.broadcast %1 : vector<1x30xf32> to vector<8x30xf32>
      %56 = arith.addf %54, %55 : vector<8x30xf32>
      %57 = arith.mulf %43, %56 : vector<8x30xf32>
      %58 = arith.addf %53, %57 : vector<8x30xf32>
      %59 = math.tanh %58 : vector<8x30xf32>
      %cst_44 = arith.constant 1.000000e+00 : f32
      %60 = vector.broadcast %cst_44 : f32 to vector<8x30xf32>
      %61 = arith.subf %60, %52 : vector<8x30xf32>
      %62 = arith.mulf %61, %59 : vector<8x30xf32>
      %63 = arith.mulf %52, %arg20 : vector<8x30xf32>
      %64 = arith.addf %62, %63 : vector<8x30xf32>
      %65 = arith.index_cast %arg19 : i32 to index
      %66 = memref.load %arg1[%65] : memref<8xi32, #tpu.memory_space<smem>>
      %c0_i32_45 = arith.constant 0 : i32
      %67 = arith.subi %66, %c0_i32_45 : i32
      %68 = arith.addi %c0_i32_45, %67 : i32
      %c1_i32_46 = arith.constant 1 : i32
      %69 = scf.for %arg21 = %c0_i32_45 to %68 step %c1_i32_46 iter_args(%arg22 = %64) -> (vector<8x30xf32>)  : i32 {
        %72 = arith.index_cast %arg19 : i32 to index
        %73 = arith.index_cast %arg21 : i32 to index
        %74 = memref.load %arg0[%72, %73] : memref<8x3xf32, #tpu.memory_space<smem>>
        %cst_48 = arith.constant dense<0.000000e+00> : vector<8x64xf32>
        %75 = tpu.matmul %arg22, %2, %cst_48 {dimension_numbers = #tpu.dot_dimension_numbers<[1], [0], [0], [1], [0, 0, 1, 1], [], []>} : vector<8x30xf32>, vector<30x64xf32>, vector<8x64xf32> -> vector<8x64xf32>
        %76 = vector.broadcast %3 : vector<1x64xf32> to vector<8x64xf32>
        %77 = arith.addf %75, %76 : vector<8x64xf32>
        %78 = math.tanh %77 : vector<8x64xf32>
        %cst_49 = arith.constant dense<0.000000e+00> : vector<8x30xf32>
        %79 = tpu.matmul %78, %4, %cst_49 {dimension_numbers = #tpu.dot_dimension_numbers<[1], [0], [0], [1], [0, 0, 1, 1], [], []>} : vector<8x64xf32>, vector<64x30xf32>, vector<8x30xf32> -> vector<8x30xf32>
        %80 = vector.broadcast %5 : vector<1x30xf32> to vector<8x30xf32>
        %81 = arith.addf %79, %80 : vector<8x30xf32>
        %82 = vector.broadcast %74 : f32 to vector<8x30xf32>
        %83 = arith.mulf %82, %81 : vector<8x30xf32>
        %cst_50 = arith.constant 0.333333343 : f32
        %84 = vector.broadcast %cst_50 : f32 to vector<8x30xf32>
        %85 = arith.mulf %83, %84 : vector<8x30xf32>
        %86 = arith.addf %arg22, %85 : vector<8x30xf32>
        %cst_51 = arith.constant dense<0.000000e+00> : vector<8x64xf32>
        %87 = tpu.matmul %86, %2, %cst_51 {dimension_numbers = #tpu.dot_dimension_numbers<[1], [0], [0], [1], [0, 0, 1, 1], [], []>} : vector<8x30xf32>, vector<30x64xf32>, vector<8x64xf32> -> vector<8x64xf32>
        %88 = vector.broadcast %3 : vector<1x64xf32> to vector<8x64xf32>
        %89 = arith.addf %87, %88 : vector<8x64xf32>
        %90 = math.tanh %89 : vector<8x64xf32>
        %cst_52 = arith.constant dense<0.000000e+00> : vector<8x30xf32>
        %91 = tpu.matmul %90, %4, %cst_52 {dimension_numbers = #tpu.dot_dimension_numbers<[1], [0], [0], [1], [0, 0, 1, 1], [], []>} : vector<8x64xf32>, vector<64x30xf32>, vector<8x30xf32> -> vector<8x30xf32>
        %92 = vector.broadcast %5 : vector<1x30xf32> to vector<8x30xf32>
        %93 = arith.addf %91, %92 : vector<8x30xf32>
        %cst_53 = arith.constant 0.333333343 : f32
        %94 = vector.broadcast %cst_53 : f32 to vector<8x30xf32>
        %95 = arith.mulf %81, %94 : vector<8x30xf32>
        %96 = arith.subf %93, %95 : vector<8x30xf32>
        %97 = vector.broadcast %74 : f32 to vector<8x30xf32>
        %98 = arith.mulf %97, %96 : vector<8x30xf32>
        %99 = arith.addf %arg22, %98 : vector<8x30xf32>
        %cst_54 = arith.constant dense<0.000000e+00> : vector<8x64xf32>
        %100 = tpu.matmul %99, %2, %cst_54 {dimension_numbers = #tpu.dot_dimension_numbers<[1], [0], [0], [1], [0, 0, 1, 1], [], []>} : vector<8x30xf32>, vector<30x64xf32>, vector<8x64xf32> -> vector<8x64xf32>
        %101 = vector.broadcast %3 : vector<1x64xf32> to vector<8x64xf32>
        %102 = arith.addf %100, %101 : vector<8x64xf32>
        %103 = math.tanh %102 : vector<8x64xf32>
        %cst_55 = arith.constant dense<0.000000e+00> : vector<8x30xf32>
        %104 = tpu.matmul %103, %4, %cst_55 {dimension_numbers = #tpu.dot_dimension_numbers<[1], [0], [0], [1], [0, 0, 1, 1], [], []>} : vector<8x64xf32>, vector<64x30xf32>, vector<8x30xf32> -> vector<8x30xf32>
        %105 = vector.broadcast %5 : vector<1x30xf32> to vector<8x30xf32>
        %106 = arith.addf %104, %105 : vector<8x30xf32>
        %107 = arith.subf %81, %93 : vector<8x30xf32>
        %108 = arith.addf %107, %106 : vector<8x30xf32>
        %109 = vector.broadcast %74 : f32 to vector<8x30xf32>
        %110 = arith.mulf %109, %108 : vector<8x30xf32>
        %111 = arith.addf %arg22, %110 : vector<8x30xf32>
        %cst_56 = arith.constant dense<0.000000e+00> : vector<8x64xf32>
        %112 = tpu.matmul %111, %2, %cst_56 {dimension_numbers = #tpu.dot_dimension_numbers<[1], [0], [0], [1], [0, 0, 1, 1], [], []>} : vector<8x30xf32>, vector<30x64xf32>, vector<8x64xf32> -> vector<8x64xf32>
        %113 = vector.broadcast %3 : vector<1x64xf32> to vector<8x64xf32>
        %114 = arith.addf %112, %113 : vector<8x64xf32>
        %115 = math.tanh %114 : vector<8x64xf32>
        %cst_57 = arith.constant dense<0.000000e+00> : vector<8x30xf32>
        %116 = tpu.matmul %115, %4, %cst_57 {dimension_numbers = #tpu.dot_dimension_numbers<[1], [0], [0], [1], [0, 0, 1, 1], [], []>} : vector<8x64xf32>, vector<64x30xf32>, vector<8x30xf32> -> vector<8x30xf32>
        %117 = vector.broadcast %5 : vector<1x30xf32> to vector<8x30xf32>
        %118 = arith.addf %116, %117 : vector<8x30xf32>
        %cst_58 = arith.constant 1.250000e-01 : f32
        %119 = arith.mulf %74, %cst_58 : f32
        %120 = arith.addf %93, %106 : vector<8x30xf32>
        %cst_59 = arith.constant 3.000000e+00 : f32
        %121 = vector.broadcast %cst_59 : f32 to vector<8x30xf32>
        %122 = arith.mulf %121, %120 : vector<8x30xf32>
        %123 = arith.addf %81, %122 : vector<8x30xf32>
        %124 = arith.addf %123, %118 : vector<8x30xf32>
        %125 = vector.broadcast %119 : f32 to vector<8x30xf32>
        %126 = arith.mulf %125, %124 : vector<8x30xf32>
        %127 = arith.addf %arg22, %126 : vector<8x30xf32>
        scf.yield %127 : vector<8x30xf32>
      }
      %70 = arith.index_cast %31 : i32 to index
      %c0_47 = arith.constant 0 : index
      %71 = vector.load %arg18[%70, %c0_47] : memref<64x30xf32, #tpu.memory_space<vmem>>, vector<8x30xf32>
      tpu.vector_store %arg18[%70, %c0_47], %69 {strides = array<i32>} : memref<64x30xf32, #tpu.memory_space<vmem>>, vector<8x30xf32>,
      scf.yield %69 : vector<8x30xf32>
    }
    %c8_i32_20 = arith.constant 8 : i32
    %c0_21 = arith.constant 0 : index
    %c0_22 = arith.constant 0 : index
    %16 = vector.load %arg18[%c0_21, %c0_22] : memref<64x30xf32, #tpu.memory_space<vmem>>, vector<64x30xf32>
    %c0_23 = arith.constant 0 : index
    %c0_24 = arith.constant 0 : index
    %17 = vector.load %arg11[%c0_23, %c0_24] : memref<30x3xf32, #tpu.memory_space<vmem>>, vector<30x3xf32>
    %cst_25 = arith.constant dense<0.000000e+00> : vector<64x3xf32>
    %18 = tpu.matmul %16, %17, %cst_25 {dimension_numbers = #tpu.dot_dimension_numbers<[1], [0], [0], [1], [0, 0, 1, 1], [], []>} : vector<64x30xf32>, vector<30x3xf32>, vector<64x3xf32> -> vector<64x3xf32>
    %c0_26 = arith.constant 0 : index
    %c0_27 = arith.constant 0 : index
    %19 = vector.load %arg12[%c0_26, %c0_27] : memref<1x3xf32, #tpu.memory_space<vmem>>, vector<1x3xf32>
    %20 = vector.broadcast %19 : vector<1x3xf32> to vector<64x3xf32>
    %21 = arith.addf %18, %20 : vector<64x3xf32>
    %c0_28 = arith.constant 0 : index
    %c0_29 = arith.constant 0 : index
    %22 = vector.load %arg15[%c0_28, %c0_29] : memref<64x3xf32, #tpu.memory_space<vmem>>, vector<64x3xf32>
    tpu.vector_store %arg15[%c0_28, %c0_29], %21 {strides = array<i32>} : memref<64x3xf32, #tpu.memory_space<vmem>>, vector<64x3xf32>,
    %c0_30 = arith.constant 0 : index
    %c0_31 = arith.constant 0 : index
    %23 = vector.load %arg13[%c0_30, %c0_31] : memref<30x20xf32, #tpu.memory_space<vmem>>, vector<30x20xf32>
    %cst_32 = arith.constant dense<0.000000e+00> : vector<8x20xf32>
    %24 = tpu.matmul %15, %23, %cst_32 {dimension_numbers = #tpu.dot_dimension_numbers<[1], [0], [0], [1], [0, 0, 1, 1], [], []>} : vector<8x30xf32>, vector<30x20xf32>, vector<8x20xf32> -> vector<8x20xf32>
    %c0_33 = arith.constant 0 : index
    %c0_34 = arith.constant 0 : index
    %25 = vector.load %arg14[%c0_33, %c0_34] : memref<1x20xf32, #tpu.memory_space<vmem>>, vector<1x20xf32>
    %26 = vector.broadcast %25 : vector<1x20xf32> to vector<8x20xf32>
    %27 = arith.addf %24, %26 : vector<8x20xf32>
    %c0_35 = arith.constant 0 : index
    %c0_36 = arith.constant 0 : index
    %28 = vector.load %arg16[%c0_35, %c0_36] : memref<8x20xf32, #tpu.memory_space<vmem>>, vector<8x20xf32>
    tpu.vector_store %arg16[%c0_35, %c0_36], %27 {strides = array<i32>} : memref<8x20xf32, #tpu.memory_space<vmem>>, vector<8x20xf32>,
    return
  }
}

</mosaic_0001>

<bundles_post_ra>
// kernel: tpu_custom_call.1
= control target key start
LH: loop header
LB: loop body
LE: loop exit
PB: predicated region body
PF: predicated region fallthrough
CT: control target
= control target key end

     0   :  { %s2411_s0 = inlined_call_operand.vmem [shape: f32[8,3], index: 0, kind: input, shape index: {}]   ;;  %s2412_s1 = inlined_call_operand.vmem [shape: s32[8], index: 1, kind: input, shape index: {}]   ;;  %s2413_s2 = inlined_call_operand.vmem [shape: f32[64,50], index: 2, kind: input, shape index: {}]   ;;  %s2414_s3 = inlined_call_operand.vmem [shape: f32[50,90], index: 3, kind: input, shape index: {}]   ;;  %s2415_s4 = inlined_call_operand.vmem [shape: f32[1,90], index: 4, kind: input, shape index: {}]   ;;  %s2416_s5 = inlined_call_operand.vmem [shape: f32[30,90], index: 5, kind: input, shape index: {}]   ;;  %s2417_s6 = inlined_call_operand.vmem [shape: f32[1,30], index: 6, kind: input, shape index: {}]   ;;  %s2418_s7 = inlined_call_operand.vmem [shape: f32[30,64], index: 7, kind: input, shape index: {}]   ;;  %s2419_s8 = inlined_call_operand.vmem [shape: f32[1,64], index: 8, kind: input, shape index: {}]   ;;  %s2420_s9 = inlined_call_operand.vmem [shape: f32[64,30], index: 9, kind: input, shape index: {}]   ;;  %s2421_s10 = inlined_call_operand.vmem [shape: f32[1,30], index: 10, kind: input, shape index: {}]   ;;  %s2422_s11 = inlined_call_operand.vmem [shape: f32[30,3], index: 11, kind: input, shape index: {}]   ;;  %s2423_s12 = inlined_call_operand.vmem [shape: f32[1,3], index: 12, kind: input, shape index: {}]   ;;  %s2424_s13 = inlined_call_operand.vmem [shape: f32[30,20], index: 13, kind: input, shape index: {}]   ;;  %s2425_s14 = inlined_call_operand.vmem [shape: f32[1,20], index: 14, kind: input, shape index: {}]   ;;  %s2426_s15 = inlined_call_operand.vmem [shape: f32[64,3], index: 15, kind: output, shape index: {0}]   ;;  %s2427_s16 = inlined_call_operand.hbm [shape: f32[8,20], index: 16, kind: output, shape index: {1}]  }
   0x1   :  { %2428 = sst [smem:[#allocation13_spill]] %s2411_s0 }
   0x2   :  { %22 = vsyncpa [#allocation6], 0 }
   0x3   :  { %23 = vsyncpa [#allocation8], 0 }
   0x4   :  { %24 = vsyncpa [#allocation5], 0  ;;  %s2429_s23 = sld [smem:[#allocation13_spill]]  ;;  %s41_s27 = sshll.u32 %s2412_s1, 4  ;;  %s42_s27 = int_to_ptr.vmem [resolvable:$true] %s41_s27 }
   0xa   :  { %s31_s24 = sshll.u32 %s2429_s23, 4  ;;  %s32_s24 = int_to_ptr.vmem [resolvable:$true] %s31_s24 }
   0xb   :  { %s1757_s28 = scalar_lea.vmem %s32_s24, 128  ;;  %p1762_p1 = scmp.lt.s32.totalorder %s32_s24, %s32_s24 }
   0xc   :  { %p1758_p0 = scmp.ne.s32.totalorder %s32_s24, %s1757_s28  ;;  %p1763_p2 = scmp.lt.s32.totalorder %s1757_s28, %s1757_s28 }
   0xe   :  { %p1764_p3 = por %p1763_p2, %p1762_p1 }
  0x10   :  { %p1765_p4 = pnand %p1764_p3, %p1758_p0 }
  0x12   :  { %1768 = shalt.err (!%p1765_p4)
}
  0x13   :  { %s1847_s29 = smov [#allocation4]   ;;  %s1769_s30 = scalar_lea.vmem %s42_s27, 16 }
  0x14   :  { %34 = dma.vmem_to_smem %s32_s24, 128, %s1847_s29, [#allocation6]  }
  0x15   :  { %p1770_p5 = scmp.ne.s32.totalorder %s42_s27, %s1769_s30  ;;  %p1774_p6 = scmp.lt.s32.totalorder %s42_s27, %s42_s27 }
  0x16   :  { %p1775_p7 = scmp.lt.s32.totalorder %s1769_s30, %s1769_s30 }
  0x18   :  { %p1776_p8 = por %p1775_p7, %p1774_p6 }
  0x1a   :  { %p1777_p9 = pnand %p1776_p8, %p1770_p5 }
  0x1c   :  { %1780 = shalt.err (!%p1777_p9)
}
  0x1d   :  { %s1848_s0 = smov [#allocation7]  }
  0x1e   :  { %44 = dma.vmem_to_smem %s42_s27, 16, %s1848_s0, [#allocation8]  }
  0x1f   :  { %1821 = dma.done.wait [#allocation6], 128  }
  0x20   :  { %1822 = vsyncadd [#allocation6], 4294967168 }
  0x21   :  { %1823 = dma.done.wait [#allocation8], 16  }
  0x22   :  { %1824 = vsyncadd [#allocation8], 4294967280 }
  0x23   :  { %77 = sfence }
  0x24   :  { %v1956_v0 = vld [vmem:[%s2416_s5] sm:$0xff]  ;;  %v1961_v1 = vld [vmem:[%s2416_s5 + $0x8] sm:$0xff]  ;;  %v1966_v2 = vld [vmem:[%s2416_s5 + $0x10] sm:$0xff]  ;;  %vm144_vm0 = vcmask 1041408   ;;  %vm119_vm1 = vcmask 408576   ;;  %vm253_vm2 = vcmask 736256  }
  0x25   :  { %v1971_v3 = vld [vmem:[%s2416_s5 + $0x18] sm:$0x3f]  ;;  %v1976_v4 = vld [vmem:[%s2417_s6] ss:$0 sm:$0xff]  ;;  %v1986_v6 = vld [vmem:[%s2418_s7 + $0x8] sm:$0xff]  ;;  %v2112_v51 = vmov 0.0  }
  0x26   :  { %v1981_v5 = vld [vmem:[%s2418_s7] sm:$0xff]  ;;  %v1991_v7 = vld [vmem:[%s2418_s7 + $0x10] sm:$0xff]  ;;  %v1996_v8 = vld [vmem:[%s2418_s7 + $0x18] sm:$0x3f] }
  0x27   :  { %v2001_v9 = vld [vmem:[%s2419_s8] ss:$0 sm:$0xff]  ;;  %v2011_v11 = vld [vmem:[%s2420_s9 + $0x8] sm:$0xff]  ;;  %v2016_v12 = vld [vmem:[%s2420_s9 + $0x10] sm:$0xff] }
  0x28   :  { %v2006_v10 = vld [vmem:[%s2420_s9] sm:$0xff]  ;;  %v2021_v13 = vld [vmem:[%s2420_s9 + $0x18] sm:$0xff]  ;;  %v2031_v15 = vld [vmem:[%s2420_s9 + $0x28] sm:$0xff] }
  0x29   :  { %v2026_v14 = vld [vmem:[%s2420_s9 + $0x20] sm:$0xff]  ;;  %v2036_v16 = vld [vmem:[%s2420_s9 + $0x30] sm:$0xff]  ;;  %v2041_v17 = vld [vmem:[%s2420_s9 + $0x38] sm:$0xff] }
  0x2a   :  { %v2046_v18 = vld [vmem:[%s2421_s10] ss:$0 sm:$0xff]  ;;  %v111_v19 = vld [vmem:[%s2414_s3 + $0x30] sm:$0x3]  ;;  %v110_v20 = vld [vmem:[%s2414_s3 + $0x28] sm:$0xff] }
  0x2b   :  { %1486 = vmatprep.subr.msk.mxu0 %vm144_vm0, %v111_v19  ;;  %1674 = vmatprep.subr.msk.mxu1 %vm144_vm0, %v111_v19  ;;  %v109_v21 = vld [vmem:[%s2414_s3 + $0x20] sm:$0xff]  ;;  %v108_v22 = vld [vmem:[%s2414_s3 + $0x18] sm:$0xff]  ;;  %v107_v23 = vld [vmem:[%s2414_s3 + $0x10] sm:$0xff] }
  0x2c   :  { %1487 = vmatpush3.msk.msra.mxu0 %vm144_vm0, %v111_v19  ;;  %1681 = vmatpush3.msk.msra.mxu1 %vm144_vm0, %v111_v19  ;;  %v106_v24 = vld [vmem:[%s2414_s3 + $0x8] sm:$0xff]  ;;  %v105_v25 = vld [vmem:[%s2414_s3] sm:$0xff]  ;;  %v99_v30 = vld [vmem:[%s2413_s2 + $0x10] sm:$0xff] }
  0x2d   :  { %1488 = vmatprep.subr.mxu0 %v110_v20  ;;  %1675 = vmatprep.subr.mxu1 %v110_v20  ;;  %v97_v26 = vld [vmem:[%s2413_s2] sm:$0xff]  ;;  %v98_v28 = vld [vmem:[%s2413_s2 + $0x8] sm:$0xff]  ;;  %v103_v31 = vld [vmem:[%s2413_s2 + $0x30] sm:$0xff] }
  0x2e   :  { %1489 = vmatpush3.msra.mxu0 %v110_v20  ;;  %1682 = vmatpush3.msra.mxu1 %v110_v20  ;;  %v101_v27 = vld [vmem:[%s2413_s2 + $0x20] sm:$0xff]  ;;  %v102_v29 = vld [vmem:[%s2413_s2 + $0x28] sm:$0xff]  ;;  %v100_v32 = vld [vmem:[%s2413_s2 + $0x18] sm:$0xff] }
  0x2f   :  { %1490 = vmatprep.subr.mxu0 %v109_v21  ;;  %1676 = vmatprep.subr.mxu1 %v109_v21  ;;  %v104_v33 = vld [vmem:[%s2413_s2 + $0x38] sm:$0xff]  ;;  %v1350_v34 = vld [vmem:[%s2415_s4] ss:$0 sm:$0xff]  ;;  %s2114_s2 = smov 0  }
  0x30   :  { %1491 = vmatpush3.msra.mxu0 %v109_v21  ;;  %1683 = vmatpush3.msra.mxu1 %v109_v21 }
  0x31   :  { %1492 = vmatprep.subr.mxu0 %v108_v22  ;;  %1677 = vmatprep.subr.mxu1 %v108_v22 }
  0x32   :  { %1493 = vmatpush3.msra.mxu0 %v108_v22  ;;  %1684 = vmatpush3.msra.mxu1 %v108_v22 }
  0x33   :  { %1494 = vmatprep.subr.mxu0 %v107_v23  ;;  %1678 = vmatprep.subr.mxu1 %v107_v23 }
  0x34   :  { %1495 = vmatpush3.msra.mxu0 %v107_v23  ;;  %1685 = vmatpush3.msra.mxu1 %v107_v23 }
  0x35   :  { %1496 = vmatprep.subr.mxu0 %v106_v24  ;;  %1679 = vmatprep.subr.mxu1 %v106_v24 }
  0x36   :  { %1497 = vmatpush3.msra.mxu0 %v106_v24  ;;  %1686 = vmatpush3.msra.mxu1 %v106_v24 }
  0x37   :  { %1498 = vmatprep.subr.mxu0 %v105_v25  ;;  %1680 = vmatprep.subr.mxu1 %v105_v25 }
  0x38   :  { %1499 = vmatpush3.msra.mxu0 %v105_v25  ;;  %1687 = vmatpush3.msra.mxu1 %v105_v25 }
  0x39   :  { %1500 = vmatprep.mubr.msk.f32.mxu0 %vm119_vm1, %v97_v26  ;;  %1506 = vmatprep.mubr.msk.f32.mxu1 %vm119_vm1, %v101_v27 }
  0x3a   :  { %1501 = vmatmul.mubr.msk.f32.vlgmr.msra.gmra.mxu0 %vm119_vm1, %v98_v28  ;;  %1507 = vmatmul.mubr.msk.f32.vlgmr.msra.gmra.mxu1 %vm119_vm1, %v102_v29 }
  0x3b   :  { %1503 = vmatprep.mubr.msk.f32.mxu0 %vm119_vm1, %v99_v30  ;;  %1509 = vmatprep.mubr.msk.f32.mxu1 %vm119_vm1, %v103_v31 }
  0x3e   :  { %1504 = vmatmul.mubr.msk.f32.gmra.mxu0 %vm119_vm1, %v100_v32  ;;  %1510 = vmatmul.mubr.msk.f32.gmra.mxu1 %vm119_vm1, %v104_v33 }
  0xfa   :  { %v1502_v35 = vpop.f32.mrf.mxu0  ;;  %v1508_v36 = vpop.f32.mrf.mxu1 }
  0xfb   :  { %v220_v37 = vadd.f32 %v1502_v35, %v1350_v34  ;;  %v240_v38 = vadd.f32 %v1508_v36, %v1350_v34 }
  0xfc   :  { %v214_v39 = vpop.f32.mrf.mxu0  ;;  %v234_v40 = vpop.f32.mrf.mxu1 }
  0xfd   :  { %255 = vst.msk [vmem:[#allocation2 + $0x8] sm:$0xff] %vm253_vm2, %v220_v37  ;;  %259 = vst.msk [vmem:[#allocation2 + $0x28] sm:$0xff] %vm253_vm2, %v240_v38  ;;  %v215_v41 = vadd.f32 %v1350_v34, %v214_v39  ;;  %v235_v42 = vadd.f32 %v1350_v34, %v234_v40 }
  0xfe   :  { %v1505_v43 = vpop.f32.mrf.mxu0  ;;  %v1511_v44 = vpop.f32.mrf.mxu1 }
  0xff   :  { %254 = vst.msk [vmem:[#allocation2] sm:$0xff] %vm253_vm2, %v215_v41  ;;  %258 = vst.msk [vmem:[#allocation2 + $0x20] sm:$0xff] %vm253_vm2, %v235_v42  ;;  %v230_v45 = vadd.f32 %v1505_v43, %v1350_v34  ;;  %v250_v46 = vadd.f32 %v1511_v44, %v1350_v34 }
 0x100   :  { %v224_v47 = vpop.f32.mrf.mxu0  ;;  %v244_v48 = vpop.f32.mrf.mxu1 }
 0x101   :  { %257 = vst.msk [vmem:[#allocation2 + $0x18] sm:$0xff] %vm253_vm2, %v230_v45  ;;  %261 = vst.msk [vmem:[#allocation2 + $0x38] sm:$0xff] %vm253_vm2, %v250_v46  ;;  %v225_v49 = vadd.f32 %v1350_v34, %v224_v47  ;;  %v245_v50 = vadd.f32 %v1350_v34, %v244_v48 }
 0x103   :  { %256 = vst.msk [vmem:[#allocation2 + $0x10] sm:$0xff] %vm253_vm2, %v225_v49  ;;  %260 = vst.msk [vmem:[#allocation2 + $0x30] sm:$0xff] %vm253_vm2, %v245_v50 }
 0x104 LB: > { %vm279_vm3 = vcmask 1045504   ;;  %v1849_v52 = vmov 0.0   ;;  %vm1850_vm4 = vmmov 0   ;;  %s1851_s4 = smov 98   ;;  %s1852_s23 = smov 60   ;;  %vm276_vm5 = vcmask 244736   ;;  %s1833_s2 = sphi %s2114_s2, %s267_s2   ;;  %v1829_v51 = vphi %v2112_v51, %v2433_v51  }
 0x105   : > { %1512 = vmatprep.subr.mxu0 %v1849_v52  ;;  %1520 = vmatprep.mubr.msk.f32.mxu0 %vm1850_vm4, %v1849_v52  ;;  %s2129_s7 = sld [smem:[#allocation7 + %s1833_s2]]  ;;  %s1853_s24 = smov 68  }
 0x106   : > { %274 = vrot.lane.b32.xlu0 %v1829_v51, %s1851_s4  ;;  %1513 = vmatpush3.msk.msra.mxu0 %vm279_vm3, %v1971_v3  ;;  %s269_s8 = ssub.s32 7, %s1833_s2 }
 0x107   : > { %1514 = vmatprep.subr.mxu0 %v1849_v52  ;;  %s2132_s25 = sshll.u32 %s269_s8, 3 }
 0x108   : > { %1515 = vmatpush3.msra.mxu0 %v1966_v2  ;;  %s271_s26 = scalar_lea.vmem [#allocation2], %s2132_s25 }
 0x109   : > { %1516 = vmatprep.subr.mxu0 %v1849_v52 }
 0x10a   : > { %1517 = vmatpush3.msra.mxu0 %v1961_v1  ;;  %364 = vrot.lane.b32.xlu0 %v1976_v4, %s1852_s23  ;;  %v272_v58 = vld [vmem:[%s271_s26] sm:$0xff] }
 0x10b   : > { %1518 = vmatprep.subr.mxu0 %v1849_v52  ;;  %p1364_p10 = scmp.le.s32.totalorder %s2129_s7, 0 }
 0x10c   : > { %1519 = vmatpush3.msra.mxu0 %v1956_v0  ;;  %s2141_s27 = smov (!%p1364_p10), 0  }
 0x178   : > { %v275_v53 = vpop.permute.xlu0 %274 }
 0x179   : > { %1521 = vmatmul.mubr.msk.f32.vlgmr.msra.gmra.mxu0 %vm276_vm5, %v275_v53 }
 0x17c   : > { %v365_v54 = vpop.permute.xlu0 %364 }
 0x239   : > { %v349_v55 = vpop.f32.mrf.mxu0 }
 0x23a   : > { %v367_v56 = vadd.f32 %v365_v54, %v349_v55  ;;  %v353_v59 = vadd.f32 %v349_v55, %v272_v58 }
 0x23b   : > { %v1522_v57 = vpop.f32.mrf.mxu0 }
 0x23c   : > { %369 = vrot.lane.b32.xlu1 %v367_v56, %s1853_s24  ;;  %v354_v60 = vsub.f32 0.0, %v353_v59 }
 0x23e   : > { %v355_v61 = vmul.f32 1.442695, %v354_v60 }
 0x240   : > { %1743 = vpow2.f32 %v355_v61 }
 0x24d   : > { %v1744_v62 = vpop.eup %1743 }
 0x24e   : > { %v357_v63 = vadd.f32 1.0, %v1744_v62 }
 0x250   : > { %1745 = vrcp.f32 %v357_v63 }
 0x25d   : > { %v1746_v19 = vpop.eup %1745 }
 0x25e   : > { %v379_v25 = vsub.f32 1.0, %v1746_v19  ;;  %v385_v27 = vmul.f32 %v1829_v51, %v1746_v19 }
 0x2ae   : > { %v370_v20 = vpop.permute.xlu1 %369 }
 0x2af   : > { %v372_v21 = vmul.f32 %v1746_v19, %v370_v20 }
 0x2b1   : > { %374 = vrot.lane.b32.xlu1 %v372_v21, %s1852_s23 }
 0x323   : > { %v375_v22 = vpop.permute.xlu1 %374 }
 0x324   : > { %v377_v23 = vadd.f32 %v375_v22, %v272_v58 }
 0x326   : > { %1747 = vtanh.f32 %v377_v23 }
 0x333   : > { %v1748_v24 = vpop.eup %1747 }
 0x334   : > { %381 = vrot.lane.b32.xlu0 %v1748_v24, %s1851_s4 }
 0x3a6   : > { %v382_v26 = vpop.permute.xlu0 %381 }
 0x3a7   : > { %v384_v28 = vmul.f32 %v382_v26, %v379_v25  ;;  %1337 = sbr.rel (%p1364_p10) target bundleno = 3503 (0xdaf), region = 106 }
 0x3a9   : > { %v386_v29 = vadd.f32 %v385_v27, %v384_v28  }
 0x3ab   : > { %v2430_v30 = vmov %v386_v29 }
 0x3ac LB: >> { %v1854_v31 = vmov 0.0   ;;  %vm1855_vm6 = vmmov 0   ;;  %s1856_s28 = smov 98   ;;  %vm494_vm7 = vcmask 523264   ;;  %s395_s29 = sshra.s32 %s1841_s27, 7  ;;  %s1841_s27 = sphi %s2141_s27, %s391_s27   ;;  %v1837_v29 = vphi %v386_v29, %v2431_v29  }
 0x3ad   : >> { %1523 = vmatprep.subr.mxu1 %v1854_v31  ;;  %1531 = vmatprep.mubr.msk.f32.mxu1 %vm1855_vm6, %v1854_v31  ;;  %s397_s30 = sadd.s32 %s1833_s2, %s395_s29  ;;  %s400_s3 = sand.u32 127, %s1841_s27 }
 0x3ae   : >> { %410 = vrot.lane.b32.xlu0 %v1837_v29, %s1856_s28  ;;  %1524 = vmatpush3.msk.msra.mxu1 %vm279_vm3, %v1996_v8  ;;  %s1365_s0 = sshll.u32 %s397_s30, 7  ;;  %s1857_s6 = smov 30  }
 0x3af   : >> { %1525 = vmatprep.subr.mxu1 %v1854_v31  ;;  %1553 = vmatprep.subr.mxu0 %v1854_v31  ;;  %s401_s5 = sadd.s32 %s1365_s0, %s400_s3  ;;  %s391_s27 = sadd.s32 1, %s1841_s27  }
 0x3b0   : >> { %1526 = vmatpush3.msra.mxu1 %v1991_v7  ;;  %1554 = vmatpush3.msk.msra.mxu0 %vm279_vm3, %v1996_v8  ;;  %s2210_s1 = sld [smem:[#allocation4 + %s401_s5]]  ;;  %p390_p11 = scmp.ge.s32.totalorder %s391_s27, %s2129_s7 }
 0x3b1   : >> { %1527 = vmatprep.subr.mxu1 %v1854_v31  ;;  %1555 = vmatprep.subr.mxu0 %v1854_v31 }
 0x3b2   : >> { %1528 = vmatpush3.msra.mxu1 %v1986_v6  ;;  %1556 = vmatpush3.msra.mxu0 %v1991_v7 }
 0x3b3   : >> { %1529 = vmatprep.subr.mxu1 %v1854_v31  ;;  %1557 = vmatprep.subr.mxu0 %v1854_v31 }
 0x3b4   : >> { %1530 = vmatpush3.msra.mxu1 %v1981_v5  ;;  %1558 = vmatpush3.msra.mxu0 %v1986_v6 }
 0x3b5   : >> { %1534 = vmatprep.subr.mxu1 %v1854_v31  ;;  %1559 = vmatprep.subr.mxu0 %v1854_v31 }
 0x3b6   : >> { %1560 = vmatpush3.msra.mxu0 %v1981_v5  ;;  %1561 = vmatprep.mubr.msk.f32.mxu0 %vm1855_vm6, %v1854_v31  ;;  %v2213_v38 = vstv %s2210_s1  ;;  %s1039_s17 = smul.f32 0.125, %s2210_s1 }
 0x3b7   : >> { %1564 = vmatprep.subr.mxu0 %v1854_v31 }
 0x420   : >> { %v411_v32 = vpop.permute.xlu0 %410 }
 0x421   : >> { %1532 = vmatmul.mubr.msk.f32.vlgmr.msra.gmra.mxu1 %vm276_vm5, %v411_v32 }
 0x422   : >> { %1535 = vmatpush3.msra.mxu1 %v2041_v17  ;;  %1550 = vmatprep.mubr.msk.f32.mxu1 %vm1855_vm6, %v1854_v31 }
 0x423   : >> { %1536 = vmatprep.subr.mxu1 %v1854_v31 }
 0x424   : >> { %1537 = vmatpush3.msra.mxu1 %v2036_v16 }
 0x425   : >> { %1538 = vmatprep.subr.mxu1 %v1854_v31 }
 0x426   : >> { %1539 = vmatpush3.msra.mxu1 %v2031_v15 }
 0x427   : >> { %1540 = vmatprep.subr.mxu1 %v1854_v31 }
 0x428   : >> { %1541 = vmatpush3.msra.mxu1 %v2026_v14 }
 0x429   : >> { %1542 = vmatprep.subr.mxu1 %v1854_v31 }
 0x42a   : >> { %1543 = vmatpush3.msra.mxu1 %v2021_v13 }
 0x42b   : >> { %1544 = vmatprep.subr.mxu1 %v1854_v31 }
 0x42c   : >> { %1545 = vmatpush3.msra.mxu1 %v2016_v12 }
 0x42d   : >> { %1546 = vmatprep.subr.mxu1 %v1854_v31 }
 0x42e   : >> { %1547 = vmatpush3.msra.mxu1 %v2011_v11 }
 0x42f   : >> { %1548 = vmatprep.subr.mxu1 %v1854_v31 }
 0x430   : >> { %1549 = vmatpush3.msra.mxu1 %v2006_v10 }
 0x431   : >> { %1583 = vmatprep.subr.mxu1 %v1854_v31 }
 0x4e1   : >> { %v483_v33 = vpop.f32.mrf.mxu1 }
 0x4e2   : >> { %v484_v34 = vadd.f32 %v2001_v9, %v483_v33 }
 0x4e3   : >> { %v1533_v35 = vpop.f32.mrf.mxu1 }
 0x4e4   : >> { %1749 = vtanh.f32 %v484_v34 }
 0x4f1   : >> { %v1750_v36 = vpop.eup %1749 }
 0x4f2   : >> { %1551 = vmatmul.mubr.msk.f32.vlgmr.msra.gmra.mxu1 %vm494_vm7, %v1750_v36 }
 0x4f3   : >> { %1584 = vmatpush3.msk.msra.mxu1 %vm279_vm3, %v1996_v8  ;;  %1591 = vmatprep.mubr.msk.f32.mxu1 %vm1855_vm6, %v1854_v31 }
 0x4f4   : >> { %1585 = vmatprep.subr.mxu1 %v1854_v31 }
 0x4f5   : >> { %1586 = vmatpush3.msra.mxu1 %v1991_v7 }
 0x4f6   : >> { %1587 = vmatprep.subr.mxu1 %v1854_v31 }
 0x4f7   : >> { %1588 = vmatpush3.msra.mxu1 %v1986_v6 }
 0x4f8   : >> { %1589 = vmatprep.subr.mxu1 %v1854_v31 }
 0x4f9   : >> { %1590 = vmatpush3.msra.mxu1 %v1981_v5 }
 0x4fa   : >> { %1594 = vmatprep.subr.mxu1 %v1854_v31 }
 0x5b2   : >> { %v564_v37 = vpop.f32.mrf.mxu1 }
 0x5b3   : >> { %v2216_v39 = vadd.f32 %v2046_v18, %v564_v37 }
 0x5b4   : >> { %v1552_v40 = vpop.f32.mrf.mxu1 }
 0x5b5   : >> { %v569_v41 = vmul.f32 %v2213_v38, %v2216_v39  ;;  %v725_v52 = vmul.f32 0.33333334, %v2216_v39 }
 0x5b7   : >> { %v570_v42 = vmul.f32 0.33333334, %v569_v41 }
 0x5b9   : >> { %572 = vrot.lane.b32.xlu0 %v570_v42, %s1857_s6 }
 0x62b   : >> { %v573_v43 = vpop.permute.xlu0 %572 }
 0x62c   : >> { %v575_v44 = vadd.f32 %v1837_v29, %v573_v43 }
 0x62e   : >> { %577 = vrot.lane.b32.xlu1 %v575_v44, %s1856_s28 }
 0x6a0   : >> { %v578_v45 = vpop.permute.xlu1 %577 }
 0x6a1   : >> { %1562 = vmatmul.mubr.msk.f32.vlgmr.msra.gmra.mxu0 %vm276_vm5, %v578_v45 }
 0x6a2   : >> { %1565 = vmatpush3.msra.mxu0 %v2041_v17  ;;  %1580 = vmatprep.mubr.msk.f32.mxu0 %vm1855_vm6, %v1854_v31 }
 0x6a3   : >> { %1566 = vmatprep.subr.mxu0 %v1854_v31 }
 0x6a4   : >> { %1567 = vmatpush3.msra.mxu0 %v2036_v16 }
 0x6a5   : >> { %1568 = vmatprep.subr.mxu0 %v1854_v31 }
 0x6a6   : >> { %1569 = vmatpush3.msra.mxu0 %v2031_v15 }
 0x6a7   : >> { %1570 = vmatprep.subr.mxu0 %v1854_v31 }
 0x6a8   : >> { %1571 = vmatpush3.msra.mxu0 %v2026_v14 }
 0x6a9   : >> { %1572 = vmatprep.subr.mxu0 %v1854_v31 }
 0x6aa   : >> { %1573 = vmatpush3.msra.mxu0 %v2021_v13 }
 0x6ab   : >> { %1574 = vmatprep.subr.mxu0 %v1854_v31 }
 0x6ac   : >> { %1575 = vmatpush3.msra.mxu0 %v2016_v12 }
 0x6ad   : >> { %1576 = vmatprep.subr.mxu0 %v1854_v31 }
 0x6ae   : >> { %1577 = vmatpush3.msra.mxu0 %v2011_v11 }
 0x6af   : >> { %1578 = vmatprep.subr.mxu0 %v1854_v31 }
 0x6b0   : >> { %1579 = vmatpush3.msra.mxu0 %v2006_v10 }
 0x6b1   : >> { %1613 = vmatprep.subr.mxu0 %v1854_v31 }
 0x761   : >> { %v647_v46 = vpop.f32.mrf.mxu0 }
 0x762   : >> { %v648_v47 = vadd.f32 %v2001_v9, %v647_v46 }
 0x763   : >> { %v1563_v48 = vpop.f32.mrf.mxu0 }
 0x764   : >> { %1751 = vtanh.f32 %v648_v47 }
 0x771   : >> { %v1752_v49 = vpop.eup %1751 }
 0x772   : >> { %1581 = vmatmul.mubr.msk.f32.vlgmr.msra.gmra.mxu0 %vm494_vm7, %v1752_v49 }
 0x773   : >> { %1614 = vmatpush3.msk.msra.mxu0 %vm279_vm3, %v1996_v8  ;;  %1621 = vmatprep.mubr.msk.f32.mxu0 %vm1855_vm6, %v1854_v31 }
 0x774   : >> { %1615 = vmatprep.subr.mxu0 %v1854_v31 }
 0x775   : >> { %1616 = vmatpush3.msra.mxu0 %v1991_v7 }
 0x776   : >> { %1617 = vmatprep.subr.mxu0 %v1854_v31 }
 0x777   : >> { %1618 = vmatpush3.msra.mxu0 %v1986_v6 }
 0x778   : >> { %1619 = vmatprep.subr.mxu0 %v1854_v31 }
 0x779   : >> { %1620 = vmatpush3.msra.mxu0 %v1981_v5 }
 0x77a   : >> { %1624 = vmatprep.subr.mxu0 %v1854_v31 }
 0x832   : >> { %v721_v50 = vpop.f32.mrf.mxu0 }
 0x833   : >> { %v2256_v51 = vadd.f32 %v2046_v18, %v721_v50 }
 0x834   : >> { %v1582_v53 = vpop.f32.mrf.mxu0 }
 0x835   : >> { %v726_v54 = vsub.f32 %v2256_v51, %v725_v52  ;;  %v882_v20 = vsub.f32 %v2216_v39, %v2256_v51 }
 0x837   : >> { %v727_v55 = vmul.f32 %v726_v54, %v2213_v38 }
 0x839   : >> { %729 = vrot.lane.b32.xlu1 %v727_v55, %s1857_s6 }
 0x8ab   : >> { %v730_v56 = vpop.permute.xlu1 %729 }
 0x8ac   : >> { %v732_v57 = vadd.f32 %v1837_v29, %v730_v56 }
 0x8ae   : >> { %734 = vrot.lane.b32.xlu0 %v732_v57, %s1856_s28 }
 0x920   : >> { %v735_v58 = vpop.permute.xlu0 %734 }
 0x921   : >> { %1592 = vmatmul.mubr.msk.f32.vlgmr.msra.gmra.mxu1 %vm276_vm5, %v735_v58 }
 0x922   : >> { %1595 = vmatpush3.msra.mxu1 %v2041_v17  ;;  %1610 = vmatprep.mubr.msk.f32.mxu1 %vm1855_vm6, %v1854_v31 }
 0x923   : >> { %1596 = vmatprep.subr.mxu1 %v1854_v31 }
 0x924   : >> { %1597 = vmatpush3.msra.mxu1 %v2036_v16 }
 0x925   : >> { %1598 = vmatprep.subr.mxu1 %v1854_v31 }
 0x926   : >> { %1599 = vmatpush3.msra.mxu1 %v2031_v15 }
 0x927   : >> { %1600 = vmatprep.subr.mxu1 %v1854_v31 }
 0x928   : >> { %1601 = vmatpush3.msra.mxu1 %v2026_v14 }
 0x929   : >> { %1602 = vmatprep.subr.mxu1 %v1854_v31 }
 0x92a   : >> { %1603 = vmatpush3.msra.mxu1 %v2021_v13 }
 0x92b   : >> { %1604 = vmatprep.subr.mxu1 %v1854_v31 }
 0x92c   : >> { %1605 = vmatpush3.msra.mxu1 %v2016_v12 }
 0x92d   : >> { %1606 = vmatprep.subr.mxu1 %v1854_v31 }
 0x92e   : >> { %1607 = vmatpush3.msra.mxu1 %v2011_v11 }
 0x92f   : >> { %1608 = vmatprep.subr.mxu1 %v1854_v31 }
 0x930   : >> { %1609 = vmatpush3.msra.mxu1 %v2006_v10 }
 0x9e1   : >> { %v804_v59 = vpop.f32.mrf.mxu1 }
 0x9e2   : >> { %v805_v60 = vadd.f32 %v2001_v9, %v804_v59 }
 0x9e3   : >> { %v1593_v61 = vpop.f32.mrf.mxu1 }
 0x9e4   : >> { %1753 = vtanh.f32 %v805_v60 }
 0x9f1   : >> { %v1754_v62 = vpop.eup %1753 }
 0x9f2   : >> { %1611 = vmatmul.mubr.msk.f32.vlgmr.msra.gmra.mxu1 %vm494_vm7, %v1754_v62 }
 0xab2   : >> { %v878_v63 = vpop.f32.mrf.mxu1 }
 0xab3   : >> { %v879_v19 = vadd.f32 %v2046_v18, %v878_v63 }
 0xab4   : >> { %v1612_v21 = vpop.f32.mrf.mxu1 }
 0xab5   : >> { %v883_v22 = vadd.f32 %v882_v20, %v879_v19  ;;  %v1040_v33 = vadd.f32 %v879_v19, %v2256_v51 }
 0xab7   : >> { %v884_v23 = vmul.f32 %v883_v22, %v2213_v38  ;;  %v1041_v34 = vmul.f32 3.0, %v1040_v33  ;;  %v1044_v38 = vstv %s1039_s17 }
 0xab9   : >> { %886 = vrot.lane.b32.xlu1 %v884_v23, %s1857_s6  ;;  %v1042_v37 = vadd.f32 %v1041_v34, %v2216_v39 }
 0xb2b   : >> { %v887_v24 = vpop.permute.xlu1 %886 }
 0xb2c   : >> { %v889_v25 = vadd.f32 %v1837_v29, %v887_v24 }
 0xb2e   : >> { %891 = vrot.lane.b32.xlu0 %v889_v25, %s1856_s28 }
 0xba0   : >> { %v892_v26 = vpop.permute.xlu0 %891 }
 0xba1   : >> { %1622 = vmatmul.mubr.msk.f32.vlgmr.msra.gmra.mxu0 %vm276_vm5, %v892_v26 }
 0xba2   : >> { %1625 = vmatpush3.msra.mxu0 %v2041_v17  ;;  %1640 = vmatprep.mubr.msk.f32.mxu0 %vm1855_vm6, %v1854_v31 }
 0xba3   : >> { %1626 = vmatprep.subr.mxu0 %v1854_v31 }
 0xba4   : >> { %1627 = vmatpush3.msra.mxu0 %v2036_v16 }
 0xba5   : >> { %1628 = vmatprep.subr.mxu0 %v1854_v31 }
 0xba6   : >> { %1629 = vmatpush3.msra.mxu0 %v2031_v15 }
 0xba7   : >> { %1630 = vmatprep.subr.mxu0 %v1854_v31 }
 0xba8   : >> { %1631 = vmatpush3.msra.mxu0 %v2026_v14 }
 0xba9   : >> { %1632 = vmatprep.subr.mxu0 %v1854_v31 }
 0xbaa   : >> { %1633 = vmatpush3.msra.mxu0 %v2021_v13 }
 0xbab   : >> { %1634 = vmatprep.subr.mxu0 %v1854_v31 }
 0xbac   : >> { %1635 = vmatpush3.msra.mxu0 %v2016_v12 }
 0xbad   : >> { %1636 = vmatprep.subr.mxu0 %v1854_v31 }
 0xbae   : >> { %1637 = vmatpush3.msra.mxu0 %v2011_v11 }
 0xbaf   : >> { %1638 = vmatprep.subr.mxu0 %v1854_v31 }
 0xbb0   : >> { %1639 = vmatpush3.msra.mxu0 %v2006_v10 }
 0xc61   : >> { %v961_v27 = vpop.f32.mrf.mxu0 }
 0xc62   : >> { %v962_v28 = vadd.f32 %v2001_v9, %v961_v27 }
 0xc63   : >> { %v1623_v30 = vpop.f32.mrf.mxu0 }
 0xc64   : >> { %1755 = vtanh.f32 %v962_v28 }
 0xc71   : >> { %v1756_v32 = vpop.eup %1755 }
 0xc72   : >> { %1641 = vmatmul.mubr.msk.f32.vlgmr.msra.gmra.mxu0 %vm494_vm7, %v1756_v32 }
 0xd32   : >> { %v1035_v35 = vpop.f32.mrf.mxu0 }
 0xd33   : >> { %v1036_v36 = vadd.f32 %v2046_v18, %v1035_v35 }
 0xd34   : >> { %v1642_v31 = vpop.f32.mrf.mxu0 }
 0xd35   : >> { %v1043_v40 = vadd.f32 %v1042_v37, %v1036_v36 }
 0xd37   : >> { %v1045_v41 = vmul.f32 %v1044_v38, %v1043_v40 }
 0xd39   : >> { %1047 = vrot.lane.b32.xlu1 %v1045_v41, %s1857_s6 }
 0xdaa   : > { %393 = sbr.rel (!%p390_p11) target bundleno = 940 (0x3ac), region = 112 }
 0xdab   : >> { %v1048_v42 = vpop.permute.xlu1 %1047 }
 0xdac   : >> { %v1050_v43 = vadd.f32 %v1837_v29, %v1048_v42  }
 0xdae   : >> { %v2431_v29 = vmov %v1050_v43  ;;  %v2432_v30 = vmov (%p390_p11), %v1050_v43 }
 0xdaf PF: > { %1052 = vrot.lane.b32.xlu0 %v1845_v30, %s1851_s4  ;;  %s1055_s18 = scalar_lea.vmem [#allocation3], %s2132_s25  ;;  %s267_s2 = sadd.s32 1, %s1833_s2   ;;  %v2433_v51 = vmov %v1845_v30  ;;  %v1845_v30 = vphi %v2430_v30, %v2432_v30  }
 0xdb0   : > { %p264_p12 = scmp.ge.s32.totalorder %s267_s2, 8  }
 0xdb1   :  { %v1068_v29 = vld [vmem:[%s2422_s11 + $0x18] sm:$0x3f] (%p264_p12)  ;;  %v1067_v44 = vld [vmem:[%s2422_s11 + $0x10] sm:$0xff] (%p264_p12)  ;;  %s1858_s21 = smov (%p264_p12), 98   ;;  %v1066_v46 = vld [vmem:[%s2422_s11 + $0x8] sm:$0xff] (%p264_p12)  ;;  %v1859_v0 = vmov (%p264_p12), 0.0  }
 0xdb2   :  { %1643 = vmatprep.subr.msk.mxu0 (%p264_p12), %vm279_vm3, %v1068_v29  ;;  %1663 = vmatprep.subr.mxu1 (%p264_p12), %v1859_v0  ;;  %v1222_v1 = vld [vmem:[%s2424_s13 + $0x18] sm:$0x3f] (%p264_p12)  ;;  %v1221_v2 = vld [vmem:[%s2424_s13 + $0x10] sm:$0xff] (%p264_p12)  ;;  %v1065_v3 = vld [vmem:[%s2422_s11] sm:$0xff] (%p264_p12)  ;;  %vm1860_vm8 = vmmov (%p264_p12), 0   ;;  %vm1210_vm9 = vcmask (%p264_p12), 23552  }
 0xdb3   :  { %1231 = vrot.lane.b32.xlu0 (%p264_p12), %v1845_v30, %s1858_s21  ;;  %1644 = vmatpush3.msk.msra.mxu0 (%p264_p12), %vm279_vm3, %v1068_v29  ;;  %v1220_v4 = vld [vmem:[%s2424_s13 + $0x8] sm:$0xff] (%p264_p12)  ;;  %v1219_v7 = vld [vmem:[%s2424_s13] sm:$0xff] (%p264_p12)  ;;  %s1861_s7 = smov (%p264_p12), [#allocation9]   ;;  %vm1308_vm10 = vcmask (%p264_p12), 162816  }
 0xdb4   :  { %1645 = vmatprep.subr.mxu0 (%p264_p12), %v1067_v44  ;;  %1664 = vmatpush3.msk.msra.mxu1 (%p264_p12), %vm279_vm3, %v1222_v1  ;;  %v1380_v14 = vld [vmem:[%s2423_s12] ss:$0 sm:$0xff] (%p264_p12)  ;;  %s1318_s24 = sshll.u32 (%p264_p12), %s1861_s7, 4  ;;  %s1319_s24 = int_to_ptr.vmem [resolvable:$true] %s1318_s24 }
 0xdb5   :  { %1646 = vmatpush3.msra.mxu0 (%p264_p12), %v1067_v44  ;;  %1665 = vmatprep.subr.mxu1 (%p264_p12), %v1859_v0  ;;  %v1390_v59 = vld [vmem:[%s2425_s14] ss:$0 sm:$0xff] (%p264_p12)  ;;  %s1781_s8 = scalar_lea.vmem (%p264_p12), %s1319_s24, 128  ;;  %p1786_p0 = scmp.lt.s32.totalorder (%p264_p12), %s1319_s24, %s1319_s24 }
 0xdb6   :  { %1647 = vmatprep.subr.mxu0 (%p264_p12), %v1066_v46  ;;  %1666 = vmatpush3.msra.mxu1 (%p264_p12), %v1221_v2  ;;  %p1782_p13 = scmp.ne.s32.totalorder (%p264_p12), %s1319_s24, %s1781_s8  ;;  %p1787_p1 = scmp.lt.s32.totalorder (%p264_p12), %s1781_s8, %s1781_s8 }
 0xdb7   :  { %1648 = vmatpush3.msra.mxu0 (%p264_p12), %v1066_v46  ;;  %1667 = vmatprep.subr.mxu1 (%p264_p12), %v1859_v0 }
 0xdb8   :  { %1649 = vmatprep.subr.mxu0 (%p264_p12), %v1065_v3  ;;  %1668 = vmatpush3.msra.mxu1 (%p264_p12), %v1220_v4  ;;  %p1788_p2 = por (%p264_p12), %p1787_p1, %p1786_p0 }
 0xdb9   :  { %1650 = vmatpush3.msra.mxu0 (%p264_p12), %v1065_v3  ;;  %1669 = vmatprep.subr.mxu1 (%p264_p12), %v1859_v0 }
 0xdba   :  { %1670 = vmatpush3.msra.mxu1 (%p264_p12), %v1219_v7  ;;  %1671 = vmatprep.mubr.msk.f32.mxu1 (%p264_p12), %vm1860_vm8, %v1859_v0  ;;  %p1789_p3 = pnand (%p264_p12), %p1788_p2, %p1782_p13 }
 0xe1e   :  { %266 = sbr.rel (!%p264_p12) target bundleno = 260 (0x104), region = 123 }
 0xe21   : > { %v1053_v39 = vpop.permute.xlu0 %1052 }
 0xe22   : > { %1056 = vst.msk [vmem:[%s1055_s18] sm:$0xff] %vm276_vm5, %v1053_v39 }
 0xe25   :  { %v1232_v13 = vpop.permute.xlu0 %1231 }
 0xe26   :  { %1672 = vmatmul.mubr.msk.f32.vlgmr.msra.gmra.mxu1 %vm276_vm5, %v1232_v13 }
 0xe29   :  { %v1057_v45 = vld [vmem:[#allocation3] sm:$0xff]  ;;  %v1058_v5 = vld [vmem:[#allocation3 + $0x8] sm:$0xff]  ;;  %v1059_v6 = vld [vmem:[#allocation3 + $0x10] sm:$0xff] }
 0xe2a   :  { %1651 = vmatprep.mubr.msk.f32.mxu0 %vm276_vm5, %v1057_v45  ;;  %v1060_v8 = vld [vmem:[#allocation3 + $0x18] sm:$0xff]  ;;  %v1061_v9 = vld [vmem:[#allocation3 + $0x20] sm:$0xff]  ;;  %v1062_v10 = vld [vmem:[#allocation3 + $0x28] sm:$0xff] }
 0xe2b   :  { %1652 = vmatmul.mubr.msk.f32.vlgmr.msra.gmra.mxu0 %vm276_vm5, %v1058_v5  ;;  %v1063_v11 = vld [vmem:[#allocation3 + $0x30] sm:$0xff]  ;;  %v1064_v12 = vld [vmem:[#allocation3 + $0x38] sm:$0xff] }
 0xe2c   :  { %1654 = vmatprep.mubr.msk.f32.mxu0 %vm276_vm5, %v1059_v6 }
 0xe2f   :  { %1655 = vmatmul.mubr.msk.f32.gmra.mxu0 %vm276_vm5, %v1060_v8 }
 0xe30   :  { %1657 = vmatprep.mubr.msk.f32.mxu0 %vm276_vm5, %v1061_v9 }
 0xe33   :  { %1658 = vmatmul.mubr.msk.f32.gmra.mxu0 %vm276_vm5, %v1062_v10 }
 0xe34   :  { %1660 = vmatprep.mubr.msk.f32.mxu0 %vm276_vm5, %v1063_v11 }
 0xe37   :  { %1661 = vmatmul.mubr.msk.f32.gmra.mxu0 %vm276_vm5, %v1064_v12 }
 0xee6   :  { %v1304_v60 = vpop.f32.mrf.mxu1 }
 0xee7   :  { %v1305_v61 = vadd.f32 %v1390_v59, %v1304_v60 }
 0xee8   :  { %v1673_v62 = vpop.f32.mrf.mxu1 }
 0xee9   :  { %1309 = vst.msk [vmem:[#allocation9] sm:$0xff] %vm1308_vm10, %v1305_v61 }
 0xeeb   :  { %v1653_v15 = vpop.f32.mrf.mxu0 }
 0xeec   :  { %v1177_v16 = vadd.f32 %v1653_v15, %v1380_v14 }
 0xeed   :  { %v1171_v17 = vpop.f32.mrf.mxu0 }
 0xeee   :  { %1212 = vst.msk [vmem:[%s2426_s15 + $0x8] sm:$0xff] %vm1210_vm9, %v1177_v16  ;;  %v1172_v18 = vadd.f32 %v1380_v14, %v1171_v17 }
 0xeef   :  { %v1656_v47 = vpop.f32.mrf.mxu0 }
 0xef0   :  { %1211 = vst.msk [vmem:[%s2426_s15] sm:$0xff] %vm1210_vm9, %v1172_v18  ;;  %v1187_v48 = vadd.f32 %v1656_v47, %v1380_v14 }
 0xef1   :  { %v1181_v49 = vpop.f32.mrf.mxu0 }
 0xef2   :  { %1214 = vst.msk [vmem:[%s2426_s15 + $0x18] sm:$0xff] %vm1210_vm9, %v1187_v48  ;;  %v1182_v50 = vadd.f32 %v1380_v14, %v1181_v49 }
 0xef3   :  { %v1659_v51 = vpop.f32.mrf.mxu0 }
 0xef4   :  { %1213 = vst.msk [vmem:[%s2426_s15 + $0x10] sm:$0xff] %vm1210_vm9, %v1182_v50  ;;  %v1197_v52 = vadd.f32 %v1659_v51, %v1380_v14 }
 0xef5   :  { %v1191_v53 = vpop.f32.mrf.mxu0 }
 0xef6   :  { %1216 = vst.msk [vmem:[%s2426_s15 + $0x28] sm:$0xff] %vm1210_vm9, %v1197_v52  ;;  %v1192_v54 = vadd.f32 %v1380_v14, %v1191_v53 }
 0xef7   :  { %v1662_v55 = vpop.f32.mrf.mxu0 }
 0xef8   :  { %1215 = vst.msk [vmem:[%s2426_s15 + $0x20] sm:$0xff] %vm1210_vm9, %v1192_v54  ;;  %v1207_v56 = vadd.f32 %v1662_v55, %v1380_v14 }
 0xef9   :  { %v1201_v57 = vpop.f32.mrf.mxu0 }
 0xefa   :  { %1218 = vst.msk [vmem:[%s2426_s15 + $0x38] sm:$0xff] %vm1210_vm9, %v1207_v56  ;;  %v1202_v58 = vadd.f32 %v1380_v14, %v1201_v57 }
 0xefc   :  { %1217 = vst.msk [vmem:[%s2426_s15 + $0x30] sm:$0xff] %vm1210_vm9, %v1202_v58 }
 0xefd   :  { %1792 = shalt.err (!%p1789_p3)
}
 0xefe   :  { %1321 = dma.vmem_to_hbm [thread:$0]  %s1319_s24, 128, %s2427_s16, [#allocation5]  }
 0xeff   :  { %1825 = dma.done.wait [#allocation5], 128  }
 0xf00   :  { %1826 = vsyncadd [#allocation5], 4294967168 }
 0xf01   :  { %1327 = vsyncpa [#allocation5], 1 }
 0xf02   :  { %1328 = vsyncpa [#allocation6], 1 }
 0xf03   :  { %1329 = vsyncpa [#allocation8], 1 }

</bundles_post_ra>
